<compile_context>
chip_gen: v7x
topology: tpu7x:2x2x1
jax: 0.10.0
libtpu: 0.0.40
codegen_flags: <defaults>
</compile_context>

<pallas_src>
import functools

import jax
import jax.numpy as jnp
from jax.experimental import pallas as pl
from jax.experimental.pallas import tpu as pltpu


def _round_up(x, m):
    return (x + m - 1) // m * m


# ----------------------------- Pallas kernel --------------------------------

def _fused_forward_kernel(x_ref, w_ref, b_ref, o_ref, *,
                          B, HW, K_pad, Cout, C_pad):
    """Fused: im2col-conv + ReLU -> GAP (XLU reduce) -> folded head -> ReLU.

    x_ref : (B*HW, K_pad)         bf16  im2col patches
    w_ref : (K_pad + Cout, C_pad) bf16  rows [0, K_pad)        = conv weight
                                        rows [K_pad, K_pad+Cout) = folded head
    b_ref : (1, Cout + C_pad)     f32   cols [0, Cout)   = conv bias
                                        cols [Cout, ...) = folded head bias
    o_ref : (B, C_pad)            f32
    (Cout == C_pad is guaranteed by the wrapper so the weight stack is dense.)
    """
    cw = w_ref[:K_pad, :]              # (K_pad, Cout)  static, sublane-aligned
    cb = b_ref[:, :Cout]               # (1, Cout)      static, lane-aligned

    # 3x3 conv as a single im2col matmul on the MXU; bias + ReLU in f32.
    h = jnp.dot(x_ref[...], cw, preferred_element_type=jnp.float32)   # (B*HW, Cout)
    h = jnp.maximum(h + cb, 0.0)

    # Global average pool: sublane-axis reduce (XLU), 1/HW scale applied in f32.
    pooled = jnp.sum(h.reshape(B, HW, Cout), axis=1) * jnp.float32(1.0 / HW)

    # Folded backbone-fc + linear0/1/2 head: one MXU push, bias + ReLU in f32.
    fw = w_ref[K_pad:K_pad + Cout, :]  # (Cout, C_pad)
    fb = b_ref[:, Cout:Cout + C_pad]   # (1, C_pad)
    out = jnp.dot(pooled.astype(jnp.bfloat16), fw,
                  preferred_element_type=jnp.float32) + fb
    o_ref[...] = jnp.maximum(out, 0.0)


# ------------------------------ model wrapper --------------------------------

def init_params(key, n_classes=1, stem_ch=128, feat_dim=1000):
    """Deterministic parameter init (synthetic stand-in for the checkpoint).

    Linear weights are stored (in, out) — transpose of torch's nn.Linear layout.
    stem_ch = 128 keeps the conv output lane-dense (multiple of 128).
    """
    ks = jax.random.split(key, 5)

    def dense(k, fan_in, fan_out):
        scale = (2.0 / fan_in) ** 0.5
        return scale * jax.random.normal(k, (fan_in, fan_out), jnp.float32)

    return {
        "conv_w": 0.1 * jax.random.normal(ks[0], (3, 3, 3, stem_ch), jnp.float32),
        "conv_b": jnp.zeros((stem_ch,), jnp.float32),
        "fc_w": dense(ks[1], stem_ch, feat_dim),
        "fc_b": jnp.zeros((feat_dim,), jnp.float32),
        "w0": dense(ks[2], feat_dim, 512),
        "b0": jnp.zeros((512,), jnp.float32),
        "w1": dense(ks[3], 512, 256),
        "b1": jnp.zeros((256,), jnp.float32),
        "w2": dense(ks[4], 256, n_classes),
        "b2": jnp.zeros((n_classes,), jnp.float32),
    }


def prepare_params(params, n_classes):
    """Fold + pack parameters for the kernel.  Run ONCE, outside the jit path.

    Folds fc -> linear0 -> linear1 -> linear2 (no intervening nonlinearities)
    in f32, then packs:
      w_all: (K_pad + Cout, C_pad) bf16   [conv weight ; folded head weight]
      b_all: (1, Cout + C_pad)     f32    [conv bias   | folded head bias ]
    """
    conv_w = params["conv_w"]                      # (3, 3, Cin, Cout)
    kh, kw, Cin, Cout = conv_w.shape
    K = kh * kw * Cin
    K_pad = _round_up(K, 32)
    C_pad = _round_up(max(n_classes, 128), 128)
    assert Cout == C_pad, "weight slab packing requires Cout == C_pad"

    # --- algebraic fold (all f32) ---
    fb = params["fc_b"][None, :]                                         # (1, F)
    fused_w = params["fc_w"] @ params["w0"] @ params["w1"] @ params["w2"]  # (Cout, nc)
    fused_b = ((fb @ params["w0"] + params["b0"][None, :]) @ params["w1"]
               + params["b1"][None, :]) @ params["w2"] + params["b2"][None, :]

    # --- pack weights: conv (K_pad rows) stacked over folded head (Cout rows) ---
    cw = conv_w.reshape(K, Cout)                   # row order = (kh, kw, cin)
    cw = jnp.pad(cw, ((0, K_pad - K), (0, 0)))
    fwp = jnp.pad(fused_w, ((0, 0), (0, C_pad - n_classes)))
    w_all = jnp.concatenate([cw, fwp], axis=0).astype(jnp.bfloat16)

    # --- pack biases: [conv bias | folded head bias], both 128-lane aligned ---
    cb = params["conv_b"][None, :]                                      # (1, Cout)
    fbp = jnp.pad(fused_b, ((0, 0), (0, C_pad - n_classes)))            # (1, C_pad)
    b_all = jnp.concatenate([cb, fbp], axis=1).astype(jnp.float32)

    dims = dict(K_pad=K_pad, Cout=Cout, C_pad=C_pad)
    return w_all, b_all, dims


def fishnet150_count_forward(w_all, b_all, x_nchw, *, K_pad, Cout, C_pad,
                             n_classes):
    """Forward pass. Input is PyTorch-style NCHW float32."""
    x = jnp.transpose(x_nchw, (0, 2, 3, 1)).astype(jnp.float32)   # NCHW -> NHWC
    B, H, W, Cin = x.shape
    HW = H * W
    N = B * HW
    K = 9 * Cin

    # Wrapper-side im2col packing: lane-dense (N, K_pad) LHS.
    # TODO(synk): at real FishNet spatial sizes move im2col in-kernel (shifted
    # pl.ds loads from a padded NHWC slab) to avoid the 9x HBM expansion.
    xp = jnp.pad(x, ((0, 0), (1, 1), (1, 1), (0, 0)))
    cols = [xp[:, kh:kh + H, kw:kw + W, :] for kh in range(3) for kw in range(3)]
    patches = jnp.concatenate(cols, axis=-1).reshape(N, K)
    patches = jnp.pad(patches, ((0, 0), (0, K_pad - K))).astype(jnp.bfloat16)

    kernel = functools.partial(_fused_forward_kernel,
                               B=B, HW=HW, K_pad=K_pad, Cout=Cout, C_pad=C_pad)

    cost = pl.CostEstimate(
        flops=2 * N * K_pad * Cout + 2 * N * Cout + N * Cout
              + 2 * B * Cout * C_pad,
        transcendentals=0,
        bytes_accessed=(patches.size * 2 + w_all.size * 2 + b_all.size * 4
                        + B * C_pad * 4),
    )

    vmem = pl.BlockSpec(memory_space=pltpu.MemorySpace.VMEM)
    out_full = pl.pallas_call(
        kernel,
        out_shape=jax.ShapeDtypeStruct((B, C_pad), jnp.float32),
        in_specs=[vmem, vmem, vmem],
        out_specs=vmem,
        cost_estimate=cost,
    )(patches, w_all, b_all)

    return out_full[:, :n_classes]


# ---------------------------------- main -------------------------------------

if __name__ == "__main__":
    key = jax.random.PRNGKey(0)
    k_param, k_data = jax.random.split(key)

    n_classes = 1
    params = init_params(k_param, n_classes=n_classes)
    # Param-prep fold/pack happens once, outside the per-call jit path.
    w_all, b_all, dims = prepare_params(params, n_classes)

    # Small FishNet-like input: batch=2, RGB, 16x16 spatial (NCHW like PyTorch).
    x = jax.random.normal(k_data, (2, 3, 16, 16), jnp.float32)

    fwd = jax.jit(functools.partial(
        fishnet150_count_forward,
        K_pad=dims["K_pad"], Cout=dims["Cout"], C_pad=dims["C_pad"],
        n_classes=n_classes))
    y = jax.block_until_ready(fwd(w_all, b_all, x))

    assert y.shape == (2, n_classes), y.shape
    assert bool(jnp.all(y >= 0.0)), "ReLU output must be non-negative"
    print("KERNEL_OK")
</pallas_src>

<mosaic_0001>
module attributes {stable_mosaic.version = 11 : i64} {
  func.func @_fused_forward_kernel(%arg0: memref<512x32xbf16, #tpu.memory_space<vmem>>, %arg1: memref<160x128xbf16, #tpu.memory_space<vmem>>, %arg2: memref<1x256xf32, #tpu.memory_space<vmem>>, %arg3: memref<2x128xf32, #tpu.memory_space<vmem>>) attributes {dimension_semantics = [], scalar_prefetch = 0 : i64, scratch_operands = 0 : i64, tpu.core_type = #tpu.core_type<tc>} {
    %c0 = arith.constant 0 : index
    %c0_0 = arith.constant 0 : index
    %0 = vector.load %arg1[%c0, %c0_0] : memref<160x128xbf16, #tpu.memory_space<vmem>>, vector<32x128xbf16>
    %c0_1 = arith.constant 0 : index
    %c0_2 = arith.constant 0 : index
    %1 = vector.load %arg2[%c0_1, %c0_2] : memref<1x256xf32, #tpu.memory_space<vmem>>, vector<1x128xf32>
    %c0_3 = arith.constant 0 : index
    %c0_4 = arith.constant 0 : index
    %2 = vector.load %arg0[%c0_3, %c0_4] : memref<512x32xbf16, #tpu.memory_space<vmem>>, vector<512x32xbf16>
    %cst = arith.constant dense<0.000000e+00> : vector<512x128xf32>
    %3 = tpu.matmul %2, %0, %cst {dimension_numbers = #tpu.dot_dimension_numbers<[1], [0], [0], [1], [0, 0, 1, 1], [], []>} : vector<512x32xbf16>, vector<32x128xbf16>, vector<512x128xf32> -> vector<512x128xf32>
    %4 = vector.broadcast %1 : vector<1x128xf32> to vector<512x128xf32>
    %5 = arith.addf %3, %4 : vector<512x128xf32>
    %cst_5 = arith.constant 0.000000e+00 : f32
    %6 = vector.broadcast %cst_5 : f32 to vector<512x128xf32>
    %7 = arith.maximumf %5, %6 : vector<512x128xf32>
    %8 = vector.shape_cast %7 : vector<512x128xf32> to vector<2x256x128xf32>
    %cst_6 = arith.constant dense<0.000000e+00> : vector<2x128xf32>
    %9 = vector.multi_reduction <add>, %8, %cst_6 [1] : vector<2x256x128xf32> to vector<2x128xf32>
    %cst_7 = arith.constant 3.906250e-03 : f32
    %10 = vector.broadcast %cst_7 : f32 to vector<2x128xf32>
    %11 = arith.mulf %9, %10 : vector<2x128xf32>
    %c32 = arith.constant 32 : index
    %c0_8 = arith.constant 0 : index
    %12 = vector.load %arg1[%c32, %c0_8] : memref<160x128xbf16, #tpu.memory_space<vmem>>, vector<128x128xbf16>
    %c0_9 = arith.constant 0 : index
    %c128 = arith.constant 128 : index
    %13 = vector.load %arg2[%c0_9, %c128] : memref<1x256xf32, #tpu.memory_space<vmem>>, vector<1x128xf32>
    %14 = arith.truncf %11 : vector<2x128xf32> to vector<2x128xbf16>
    %cst_10 = arith.constant dense<0.000000e+00> : vector<2x128xf32>
    %15 = tpu.matmul %14, %12, %cst_10 {dimension_numbers = #tpu.dot_dimension_numbers<[1], [0], [0], [1], [0, 0, 1, 1], [], []>} : vector<2x128xbf16>, vector<128x128xbf16>, vector<2x128xf32> -> vector<2x128xf32>
    %16 = vector.broadcast %13 : vector<1x128xf32> to vector<2x128xf32>
    %17 = arith.addf %15, %16 : vector<2x128xf32>
    %cst_11 = arith.constant 0.000000e+00 : f32
    %18 = vector.broadcast %cst_11 : f32 to vector<2x128xf32>
    %19 = arith.maximumf %17, %18 : vector<2x128xf32>
    %c0_12 = arith.constant 0 : index
    %c0_13 = arith.constant 0 : index
    %20 = vector.load %arg3[%c0_12, %c0_13] : memref<2x128xf32, #tpu.memory_space<vmem>>, vector<2x128xf32>
    tpu.vector_store %arg3[%c0_12, %c0_13], %19 {strides = array<i32>} : memref<2x128xf32, #tpu.memory_space<vmem>>, vector<2x128xf32>,
    return
  }
}

</mosaic_0001>

<bundles_post_ra>
// kernel: fishnet150_count_forward.1
= control target key start
LH: loop header
LB: loop body
LE: loop exit
PB: predicated region body
PF: predicated region fallthrough
CT: control target
= control target key end

     0   :  { %vm262_vm0 = vcmask 261120   ;;  %v1170_v35 = vmov 0.0   ;;  %vm1171_vm1 = vmmov 0   ;;  %vm817_vm2 = vcmask 1041409   ;;  %s1522_s1 = inlined_call_operand.vmem [shape: bf16[160,128], index: 1, kind: input, shape index: {}]   ;;  %s1523_s0 = inlined_call_operand.vmem [shape: bf16[512,32], index: 0, kind: input, shape index: {}]   ;;  %s1524_s2 = inlined_call_operand.vmem [shape: f32[1,256], index: 2, kind: input, shape index: {}]   ;;  %s1525_s3 = inlined_call_operand.vmem [shape: f32[2,128], index: 3, kind: output, shape index: {}]  }
   0x1   :  { %v1128_v0 = vld [vmem:[%s1522_s1] sm:$0xff]   ;;  %v1129_v1 = vld [vmem:[%s1522_s1 + $0x8] sm:$0xff]   ;;  %v1132_v4 = vld [vmem:[%s1523_s0 + $0x10] sm:$0xff]  }
   0x2   :  { %1034 = vmatprep.subr.bf16.mxu0 %v1128_v0  ;;  %v1130_v2 = vld [vmem:[%s1523_s0] sm:$0xff]   ;;  %1122 = vmatprep.subr.bf16.mxu1 %v1128_v0  ;;  %v1131_v3 = vld [vmem:[%s1523_s0 + $0x8] sm:$0xff]   ;;  %v1133_v5 = vld [vmem:[%s1523_s0 + $0x18] sm:$0xff]  }
   0x3   :  { %1035 = vmatpush3.bf16.msra.mxu0 %v1128_v0  ;;  %1124 = vmatpush3.bf16.msra.mxu1 %v1128_v0  ;;  %v1134_v6 = vld [vmem:[%s1523_s0 + $0x20] sm:$0xff]   ;;  %v1135_v7 = vld [vmem:[%s1523_s0 + $0x28] sm:$0xff]   ;;  %v1148_v8 = vld [vmem:[%s1523_s0 + $0x90] sm:$0xff]  }
   0x4   :  { %1036 = vmatprep.subr.bf16.mxu0 %v1129_v1  ;;  %1038 = vmatprep.mubr.msk.bf16.mxu0 %vm262_vm0, %v1130_v2  ;;  %v1149_v9 = vld [vmem:[%s1523_s0 + $0x98] sm:$0xff]   ;;  %v1150_v10 = vld [vmem:[%s1523_s0 + $0xa0] sm:$0xff]   ;;  %v1136_v11 = vld [vmem:[%s1523_s0 + $0x30] sm:$0xff]  }
   0x5   :  { %1123 = vmatprep.subr.bf16.mxu1 %v1129_v1  ;;  %1074 = vmatprep.mubr.msk.bf16.mxu1 %vm262_vm0, %v1148_v8  ;;  %v1151_v12 = vld [vmem:[%s1523_s0 + $0xa8] sm:$0xff]   ;;  %v1152_v13 = vld [vmem:[%s1523_s0 + $0xb0] sm:$0xff]   ;;  %v1137_v14 = vld [vmem:[%s1523_s0 + $0x38] sm:$0xff]  }
   0x6   :  { %v1138_v15 = vld [vmem:[%s1523_s0 + $0x40] sm:$0xff]   ;;  %v1153_v16 = vld [vmem:[%s1523_s0 + $0xb8] sm:$0xff]   ;;  %v1139_v18 = vld [vmem:[%s1523_s0 + $0x48] sm:$0xff]  }
   0x7   :  { %1037 = vmatpush3.bf16.msra.mxu0 %v1129_v1  ;;  %1125 = vmatpush3.bf16.msra.mxu1 %v1129_v1  ;;  %v1154_v17 = vld [vmem:[%s1523_s0 + $0xc0] sm:$0xff]   ;;  %v1140_v19 = vld [vmem:[%s1523_s0 + $0x50] sm:$0xff]   ;;  %v1155_v20 = vld [vmem:[%s1523_s0 + $0xc8] sm:$0xff]  }
   0x8   :  { %v1156_v21 = vld [vmem:[%s1523_s0 + $0xd0] sm:$0xff]   ;;  %v1141_v22 = vld [vmem:[%s1523_s0 + $0x58] sm:$0xff]   ;;  %v1142_v23 = vld [vmem:[%s1523_s0 + $0x60] sm:$0xff]   ;;  %1102 = vmatprep.subr.bf16.mxu1 %v1170_v35 }
   0x9   :  { %v1157_v24 = vld [vmem:[%s1523_s0 + $0xd8] sm:$0xff]   ;;  %v1158_v25 = vld [vmem:[%s1523_s0 + $0xe0] sm:$0xff]   ;;  %v1143_v26 = vld [vmem:[%s1523_s0 + $0x68] sm:$0xff]  }
   0xa   :  { %1039 = vmatmul.mubr.msk.bf16.vlgmr.msra.gmra.mrb[0].mxu0 %vm262_vm0, %v1131_v3  ;;  %1075 = vmatmul.mubr.msk.bf16.vlgmr.msra.gmra.mrb[0].mxu1 %vm262_vm0, %v1149_v9  ;;  %v1144_v27 = vld [vmem:[%s1523_s0 + $0x70] sm:$0xff]   ;;  %v1159_v28 = vld [vmem:[%s1523_s0 + $0xe8] sm:$0xff]   ;;  %v1145_v30 = vld [vmem:[%s1523_s0 + $0x78] sm:$0xff]  }
   0xb   :  { %1042 = vmatprep.mubr.msk.bf16.mxu0 %vm262_vm0, %v1132_v4  ;;  %1078 = vmatprep.mubr.msk.bf16.mxu1 %vm262_vm0, %v1150_v10  ;;  %v1160_v29 = vld [vmem:[%s1523_s0 + $0xf0] sm:$0xff]   ;;  %v1146_v31 = vld [vmem:[%s1523_s0 + $0x80] sm:$0xff]   ;;  %v1161_v32 = vld [vmem:[%s1523_s0 + $0xf8] sm:$0xff]  }
   0xc   :  { %v1147_v33 = vld [vmem:[%s1523_s0 + $0x88] sm:$0xff]   ;;  %v1162_v34 = vld [vmem:[%s1522_s1 + $0x10] sm:$0xff]   ;;  %v1163_v36 = vld [vmem:[%s1522_s1 + $0x18] sm:$0xff]  }
   0xd   :  { %1103 = vmatpush3.bf16.msra.mxu1 %v1162_v34  ;;  %v1164_v37 = vld [vmem:[%s1522_s1 + $0x20] sm:$0xff]   ;;  %v1165_v49 = vld [vmem:[%s1522_s1 + $0x28] sm:$0xff]   ;;  %v1166_v58 = vld [vmem:[%s1522_s1 + $0x30] sm:$0xff]  }
   0xe   :  { %1104 = vmatprep.subr.bf16.mxu1 %v1170_v35  ;;  %v1342_v38 = vld [vmem:[%s1524_s2] ss:$0 sm:$0xff] }
  0x11   :  { %1105 = vmatpush3.bf16.msra.mxu1 %v1163_v36 }
  0x12   :  { %1043 = vmatmul.mubr.msk.bf16.gmra.mrb[4].mxu0 %vm262_vm0, %v1133_v5  ;;  %1079 = vmatmul.mubr.msk.bf16.gmra.mrb[4].mxu1 %vm262_vm0, %v1151_v12  ;;  %v1167_v5 = vld [vmem:[%s1522_s1 + $0x38] sm:$0xff]  }
  0x13   :  { %1046 = vmatprep.mubr.msk.bf16.mxu0 %vm262_vm0, %v1134_v6  ;;  %1082 = vmatprep.mubr.msk.bf16.mxu1 %vm262_vm0, %v1152_v13 }
  0x14   :  { %1106 = vmatprep.subr.bf16.mxu1 %v1170_v35 }
  0x15   :  { %1107 = vmatpush3.bf16.msra.mxu1 %v1164_v37 }
  0x16   :  { %1108 = vmatprep.subr.bf16.mxu1 %v1170_v35 }
  0x19   :  { %1109 = vmatpush3.bf16.msra.mxu1 %v1165_v49 }
  0x1a   :  { %1047 = vmatmul.mubr.msk.bf16.gmra.mrb[8].mxu0 %vm262_vm0, %v1135_v7  ;;  %1083 = vmatmul.mubr.msk.bf16.gmra.mrb[8].mxu1 %vm262_vm0, %v1153_v16  ;;  %v1168_v16 = vld [vmem:[%s1522_s1 + $0x40] sm:$0xff]  }
  0x1b   :  { %1050 = vmatprep.mubr.msk.bf16.mxu0 %vm262_vm0, %v1136_v11  ;;  %1086 = vmatprep.mubr.msk.bf16.mxu1 %vm262_vm0, %v1154_v17 }
  0x1c   :  { %1110 = vmatprep.subr.bf16.mxu1 %v1170_v35 }
  0x1d   :  { %1111 = vmatpush3.bf16.msra.mxu1 %v1166_v58 }
  0x1e   :  { %1112 = vmatprep.subr.bf16.mxu1 %v1170_v35 }
  0x21   :  { %1113 = vmatpush3.bf16.msra.mxu1 %v1167_v5 }
  0x22   :  { %1051 = vmatmul.mubr.msk.bf16.gmra.mrb[12].mxu0 %vm262_vm0, %v1137_v14  ;;  %1087 = vmatmul.mubr.msk.bf16.gmra.mrb[12].mxu1 %vm262_vm0, %v1155_v20 }
  0x23   :  { %1054 = vmatprep.mubr.msk.bf16.mxu0 %vm262_vm0, %v1138_v15  ;;  %1090 = vmatprep.mubr.msk.bf16.mxu1 %vm262_vm0, %v1156_v21 }
  0x24   :  { %1114 = vmatprep.subr.bf16.mxu1 %v1170_v35 }
  0x25   :  { %1115 = vmatpush3.bf16.msra.mxu1 %v1168_v16 }
  0x26   :  { %1116 = vmatprep.subr.bf16.mxu1 %v1170_v35 }
  0x2a   :  { %1055 = vmatmul.mubr.msk.bf16.gmra.mrb[16].mxu0 %vm262_vm0, %v1139_v18  ;;  %1091 = vmatmul.mubr.msk.bf16.gmra.mrb[16].mxu1 %vm262_vm0, %v1157_v24 }
  0x2b   :  { %1058 = vmatprep.mubr.msk.bf16.mxu0 %vm262_vm0, %v1140_v19  ;;  %1094 = vmatprep.mubr.msk.bf16.mxu1 %vm262_vm0, %v1158_v25 }
  0x32   :  { %1059 = vmatmul.mubr.msk.bf16.gmra.mrb[20].mxu0 %vm262_vm0, %v1141_v22  ;;  %1095 = vmatmul.mubr.msk.bf16.gmra.mrb[20].mxu1 %vm262_vm0, %v1159_v28 }
  0x33   :  { %1062 = vmatprep.mubr.msk.bf16.mxu0 %vm262_vm0, %v1142_v23  ;;  %1098 = vmatprep.mubr.msk.bf16.mxu1 %vm262_vm0, %v1160_v29 }
  0x3a   :  { %1063 = vmatmul.mubr.msk.bf16.gmra.mrb[24].mxu0 %vm262_vm0, %v1143_v26  ;;  %1099 = vmatmul.mubr.msk.bf16.gmra.mrb[24].mxu1 %vm262_vm0, %v1161_v32 }
  0x3b   :  { %1066 = vmatprep.mubr.msk.bf16.mxu0 %vm262_vm0, %v1144_v27  ;;  %v1169_v27 = vld [vmem:[%s1522_s1 + $0x48] sm:$0xff]   ;;  %1118 = vmatprep.mubr.msk.bf16.mxu1 %vm1171_vm1, %v1170_v35 }
  0x3c   :  { %1117 = vmatpush3.bf16.msra.mxu1 %v1169_v27 }
  0x42   :  { %1067 = vmatmul.mubr.msk.bf16.gmra.mrb[28].mxu0 %vm262_vm0, %v1145_v30 }
  0x43   :  { %1070 = vmatprep.mubr.msk.bf16.mxu0 %vm262_vm0, %v1146_v31 }
  0x4a   :  { %1071 = vmatmul.mubr.msk.bf16.gmra.mrb[32].mxu0 %vm262_vm0, %v1147_v33 }
  0xdd   :  { %v1040_v39 = vpop.f32.mrb[0].mxu0  ;;  %v1358_v0 = vpop.f32.mrb[0].mxu1 }
  0xde   :  { %v393_v40 = vpop.f32.mrb[1].mxu0  ;;  %v402_v44 = vadd.f32 %v1040_v39, %v1342_v38  ;;  %v1362_v4 = vpop.f32.mrb[1].mxu1 }
  0xdf   :  { %v394_v41 = vadd.f32 %v1342_v38, %v393_v40  ;;  %v1041_v42 = vpop.f32.mrb[2].mxu0  ;;  %v1367_v6 = vpop.f32.mrb[2].mxu1 }
  0xe0   :  { %v396_v43 = vpop.f32.mrb[3].mxu0  ;;  %v405_v47 = vadd.f32 %v1041_v42, %v1342_v38  ;;  %v650_v50 = vmax.f32 %v402_v44, 0.0  ;;  %v1369_v10 = vpop.f32.mrb[3].mxu1 }
  0xe1   :  { %v397_v45 = vadd.f32 %v1342_v38, %v396_v43  ;;  %v648_v46 = vmax.f32 %v394_v41, 0.0 }
  0xe2   :  { %v651_v54 = vmax.f32 %v405_v47, 0.0 }
  0xe3   :  { %v649_v48 = vmax.f32 %v397_v45, 0.0 }
  0xe5   :  { %v712_v51 = vadd.f32 %v649_v48, %v648_v46  ;;  %v1044_v52 = vpop.f32.mrb[4].mxu0  ;;  %v1378_v22 = vpop.f32.mrb[4].mxu1 }
  0xe6   :  { %v409_v53 = vpop.f32.mrb[5].mxu0  ;;  %v418_v60 = vadd.f32 %v1044_v52, %v1342_v38  ;;  %v1382_v26 = vpop.f32.mrb[5].mxu1 }
  0xe7   :  { %v713_v55 = vadd.f32 %v712_v51, %v650_v50  ;;  %v410_v56 = vadd.f32 %v1342_v38, %v409_v53  ;;  %v1045_v57 = vpop.f32.mrb[6].mxu0  ;;  %v1387_v28 = vpop.f32.mrb[6].mxu1 }
  0xe8   :  { %v412_v59 = vpop.f32.mrb[7].mxu0  ;;  %v421_v2 = vadd.f32 %v1045_v57, %v1342_v38  ;;  %v654_v7 = vmax.f32 %v418_v60, 0.0  ;;  %v1390_v32 = vpop.f32.mrb[7].mxu1 }
  0xe9   :  { %v652_v61 = vmax.f32 %v410_v56, 0.0  ;;  %v714_v62 = vadd.f32 %v713_v55, %v651_v54  ;;  %v413_v63 = vadd.f32 %v1342_v38, %v412_v59 }
  0xea   :  { %v655_v12 = vmax.f32 %v421_v2, 0.0 }
  0xeb   :  { %v715_v1 = vadd.f32 %v714_v62, %v652_v61  ;;  %v653_v3 = vmax.f32 %v413_v63, 0.0 }
  0xed   :  { %v716_v8 = vadd.f32 %v715_v1, %v653_v3  ;;  %v1048_v9 = vpop.f32.mrb[8].mxu0  ;;  %v1395_v35 = vpop.f32.mrb[8].mxu1 }
  0xee   :  { %v425_v11 = vpop.f32.mrb[9].mxu0  ;;  %v434_v18 = vadd.f32 %v1048_v9, %v1342_v38  ;;  %v1398_v48 = vpop.f32.mrb[9].mxu1 }
  0xef   :  { %v717_v13 = vadd.f32 %v716_v8, %v654_v7  ;;  %v426_v14 = vadd.f32 %v1342_v38, %v425_v11  ;;  %v1049_v15 = vpop.f32.mrb[10].mxu0  ;;  %v1400_v49 = vpop.f32.mrb[10].mxu1 }
  0xf0   :  { %v428_v17 = vpop.f32.mrb[11].mxu0  ;;  %v437_v24 = vadd.f32 %v1049_v15, %v1342_v38  ;;  %v658_v29 = vmax.f32 %v434_v18, 0.0  ;;  %v1402_v53 = vpop.f32.mrb[11].mxu1 }
  0xf1   :  { %v656_v19 = vmax.f32 %v426_v14, 0.0  ;;  %v718_v20 = vadd.f32 %v717_v13, %v655_v12  ;;  %v429_v21 = vadd.f32 %v1342_v38, %v428_v17 }
  0xf2   :  { %v659_v34 = vmax.f32 %v437_v24, 0.0 }
  0xf3   :  { %v719_v23 = vadd.f32 %v718_v20, %v656_v19  ;;  %v657_v25 = vmax.f32 %v429_v21, 0.0 }
  0xf5   :  { %v720_v30 = vadd.f32 %v719_v23, %v657_v25  ;;  %v1052_v31 = vpop.f32.mrb[12].mxu0  ;;  %v1407_v1 = vpop.f32.mrb[12].mxu1 }
  0xf6   :  { %v441_v33 = vpop.f32.mrb[13].mxu0  ;;  %v450_v41 = vadd.f32 %v1052_v31, %v1342_v38  ;;  %v1410_v7 = vpop.f32.mrb[13].mxu1 }
  0xf7   :  { %v721_v36 = vadd.f32 %v720_v30, %v658_v29  ;;  %v442_v37 = vadd.f32 %v1342_v38, %v441_v33  ;;  %v1053_v39 = vpop.f32.mrb[14].mxu0  ;;  %v1412_v8 = vpop.f32.mrb[14].mxu1 }
  0xf8   :  { %v444_v40 = vpop.f32.mrb[15].mxu0  ;;  %v453_v46 = vadd.f32 %v1053_v39, %v1342_v38  ;;  %v662_v50 = vmax.f32 %v450_v41, 0.0  ;;  %v1414_v13 = vpop.f32.mrb[15].mxu1 }
  0xf9   :  { %v660_v42 = vmax.f32 %v442_v37, 0.0  ;;  %v722_v43 = vadd.f32 %v721_v36, %v659_v34  ;;  %v445_v44 = vadd.f32 %v1342_v38, %v444_v40 }
  0xfa   :  { %v663_v55 = vmax.f32 %v453_v46, 0.0 }
  0xfb   :  { %v723_v45 = vadd.f32 %v722_v43, %v660_v42  ;;  %v661_v47 = vmax.f32 %v445_v44, 0.0 }
  0xfd   :  { %v724_v51 = vadd.f32 %v723_v45, %v661_v47  ;;  %v1056_v52 = vpop.f32.mrb[16].mxu0  ;;  %v1419_v25 = vpop.f32.mrb[16].mxu1 }
  0xfe   :  { %v457_v54 = vpop.f32.mrb[17].mxu0  ;;  %v466_v60 = vadd.f32 %v1056_v52, %v1342_v38  ;;  %v1422_v31 = vpop.f32.mrb[17].mxu1 }
  0xff   :  { %v725_v56 = vadd.f32 %v724_v51, %v662_v50  ;;  %v458_v57 = vadd.f32 %v1342_v38, %v457_v54  ;;  %v1057_v58 = vpop.f32.mrb[18].mxu0  ;;  %v1424_v33 = vpop.f32.mrb[18].mxu1 }
 0x100   :  { %v460_v59 = vpop.f32.mrb[19].mxu0  ;;  %v469_v3 = vadd.f32 %v1057_v58, %v1342_v38  ;;  %v666_v9 = vmax.f32 %v466_v60, 0.0  ;;  %v1426_v39 = vpop.f32.mrb[19].mxu1 }
 0x101   :  { %v664_v61 = vmax.f32 %v458_v57, 0.0  ;;  %v726_v62 = vadd.f32 %v725_v56, %v663_v55  ;;  %v461_v63 = vadd.f32 %v1342_v38, %v460_v59 }
 0x102   :  { %v667_v15 = vmax.f32 %v469_v3, 0.0 }
 0x103   :  { %v727_v2 = vadd.f32 %v726_v62, %v664_v61  ;;  %v665_v5 = vmax.f32 %v461_v63, 0.0 }
 0x105   :  { %v728_v11 = vadd.f32 %v727_v2, %v665_v5  ;;  %v1060_v12 = vpop.f32.mrb[20].mxu0  ;;  %v1431_v52 = vpop.f32.mrb[20].mxu1 }
 0x106   :  { %v473_v14 = vpop.f32.mrb[21].mxu0  ;;  %v482_v20 = vadd.f32 %v1060_v12, %v1342_v38  ;;  %v1434_v57 = vpop.f32.mrb[21].mxu1 }
 0x107   :  { %v729_v16 = vadd.f32 %v728_v11, %v666_v9  ;;  %v474_v17 = vadd.f32 %v1342_v38, %v473_v14  ;;  %v1061_v18 = vpop.f32.mrb[22].mxu0  ;;  %v1436_v58 = vpop.f32.mrb[22].mxu1 }
 0x108   :  { %v476_v19 = vpop.f32.mrb[23].mxu0  ;;  %v485_v29 = vadd.f32 %v1061_v18, %v1342_v38  ;;  %v670_v34 = vmax.f32 %v482_v20, 0.0  ;;  %v1438_v62 = vpop.f32.mrb[23].mxu1 }
 0x109   :  { %v668_v21 = vmax.f32 %v474_v17, 0.0  ;;  %v730_v23 = vadd.f32 %v729_v16, %v667_v15  ;;  %v477_v24 = vadd.f32 %v1342_v38, %v476_v19 }
 0x10a   :  { %v671_v41 = vmax.f32 %v485_v29, 0.0 }
 0x10b   :  { %v731_v27 = vadd.f32 %v730_v23, %v668_v21  ;;  %v669_v30 = vmax.f32 %v477_v24, 0.0 }
 0x10d   :  { %v732_v36 = vadd.f32 %v731_v27, %v669_v30  ;;  %v1064_v37 = vpop.f32.mrb[24].mxu0  ;;  %v1443_v17 = vpop.f32.mrb[24].mxu1 }
 0x10e   :  { %v489_v40 = vpop.f32.mrb[25].mxu0  ;;  %v498_v46 = vadd.f32 %v1064_v37, %v1342_v38  ;;  %v1446_v21 = vpop.f32.mrb[25].mxu1 }
 0x10f   :  { %v733_v42 = vadd.f32 %v732_v36, %v670_v34  ;;  %v490_v43 = vadd.f32 %v1342_v38, %v489_v40  ;;  %v1065_v44 = vpop.f32.mrb[26].mxu0  ;;  %v1448_v23 = vpop.f32.mrb[26].mxu1 }
 0x110   :  { %v492_v45 = vpop.f32.mrb[27].mxu0  ;;  %v501_v55 = vadd.f32 %v1065_v44, %v1342_v38  ;;  %v674_v59 = vmax.f32 %v498_v46, 0.0  ;;  %v1450_v30 = vpop.f32.mrb[27].mxu1 }
 0x111   :  { %v672_v47 = vmax.f32 %v490_v43, 0.0  ;;  %v734_v50 = vadd.f32 %v733_v42, %v671_v41  ;;  %v493_v51 = vadd.f32 %v1342_v38, %v492_v45 }
 0x112   :  { %v675_v2 = vmax.f32 %v501_v55, 0.0 }
 0x113   :  { %v735_v54 = vadd.f32 %v734_v50, %v672_v47  ;;  %v673_v56 = vmax.f32 %v493_v51, 0.0  ;;  %v538_v51 = vadd.f32 %v1342_v38, %v1362_v4  ;;  %v554_v4 = vadd.f32 %v1342_v38, %v1382_v26 }
 0x114   :  { %v570_v26 = vadd.f32 %v1342_v38, %v1398_v48  ;;  %v586_v48 = vadd.f32 %v1342_v38, %v1410_v7  ;;  %v602_v7 = vadd.f32 %v1342_v38, %v1422_v31  ;;  %v618_v31 = vadd.f32 %v1342_v38, %v1434_v57 }
 0x115   :  { %v736_v60 = vadd.f32 %v735_v54, %v673_v56  ;;  %v1068_v61 = vpop.f32.mrb[28].mxu0  ;;  %v634_v57 = vadd.f32 %v1342_v38, %v1446_v21 }
 0x116   :  { %v505_v63 = vpop.f32.mrb[29].mxu0  ;;  %v514_v12 = vadd.f32 %v1068_v61, %v1342_v38  ;;  %v541_v61 = vadd.f32 %v1342_v38, %v1369_v10  ;;  %v557_v10 = vadd.f32 %v1342_v38, %v1390_v32  ;;  %v573_v32 = vadd.f32 %v1342_v38, %v1402_v53 }
 0x117   :  { %v737_v3 = vadd.f32 %v736_v60, %v674_v59  ;;  %v506_v5 = vadd.f32 %v1342_v38, %v505_v63  ;;  %v1069_v9 = vpop.f32.mrb[30].mxu0  ;;  %v684_v60 = vmax.f32 %v538_v51, 0.0  ;;  %v546_v63 = vadd.f32 %v1358_v0, %v1342_v38 }
 0x118   :  { %v508_v11 = vpop.f32.mrb[31].mxu0  ;;  %v517_v19 = vadd.f32 %v1069_v9, %v1342_v38  ;;  %v678_v24 = vmax.f32 %v514_v12, 0.0  ;;  %v685_v9 = vmax.f32 %v541_v61, 0.0  ;;  %v562_v0 = vadd.f32 %v1378_v22, %v1342_v38 }
 0x119   :  { %v676_v14 = vmax.f32 %v506_v5, 0.0  ;;  %v738_v15 = vadd.f32 %v737_v3, %v675_v2  ;;  %v509_v16 = vadd.f32 %v1342_v38, %v508_v11  ;;  %v549_v5 = vadd.f32 %v1367_v6, %v1342_v38 }
 0x11a   :  { %v679_v36 = vmax.f32 %v517_v19, 0.0  ;;  %v686_v11 = vmax.f32 %v546_v63, 0.0  ;;  %v565_v6 = vadd.f32 %v1387_v28, %v1342_v38  ;;  %v578_v22 = vadd.f32 %v1395_v35, %v1342_v38 }
 0x11b   :  { %v739_v18 = vadd.f32 %v738_v15, %v676_v14  ;;  %v677_v20 = vmax.f32 %v509_v16, 0.0  ;;  %v687_v14 = vmax.f32 %v549_v5, 0.0  ;;  %v688_v16 = vmax.f32 %v554_v4, 0.0 }
 0x11c   :  { %v581_v28 = vadd.f32 %v1400_v49, %v1342_v38  ;;  %v589_v53 = vadd.f32 %v1342_v38, %v1414_v13  ;;  %v594_v35 = vadd.f32 %v1407_v1, %v1342_v38  ;;  %v597_v49 = vadd.f32 %v1412_v8, %v1342_v38 }
 0x11d   :  { %v740_v27 = vadd.f32 %v739_v18, %v677_v20  ;;  %v1072_v29 = vpop.f32.mrb[32].mxu0  ;;  %v689_v20 = vmax.f32 %v557_v10, 0.0  ;;  %v700_v61 = vmax.f32 %v602_v7, 0.0  ;;  %v605_v13 = vadd.f32 %v1342_v38, %v1426_v39 }
 0x11e   :  { %v521_v34 = vpop.f32.mrb[33].mxu0  ;;  %v530_v44 = vadd.f32 %v1072_v29, %v1342_v38  ;;  %v691_v29 = vmax.f32 %v565_v6, 0.0  ;;  %v610_v1 = vadd.f32 %v1419_v25, %v1342_v38  ;;  %v613_v8 = vadd.f32 %v1424_v33, %v1342_v38 }
 0x11f   :  { %v741_v37 = vadd.f32 %v740_v27, %v678_v24  ;;  %v522_v40 = vadd.f32 %v1342_v38, %v521_v34  ;;  %v1073_v41 = vpop.f32.mrb[34].mxu0  ;;  %v690_v24 = vmax.f32 %v562_v0, 0.0  ;;  %v621_v39 = vadd.f32 %v1342_v38, %v1438_v62 }
 0x120   :  { %v524_v42 = vpop.f32.mrb[35].mxu0  ;;  %v533_v47 = vadd.f32 %v1073_v41, %v1342_v38  ;;  %v682_v54 = vmax.f32 %v530_v44, 0.0  ;;  %v693_v41 = vmax.f32 %v573_v32, 0.0  ;;  %v702_v5 = vmax.f32 %v610_v1, 0.0 }
 0x121   :  { %v1453_v43 = vadd.f32 %v741_v37, %v679_v36  ;;  %v525_v45 = vadd.f32 %v1342_v38, %v524_v42  ;;  %v680_v46 = vmax.f32 %v522_v40, 0.0  ;;  %v692_v36 = vmax.f32 %v570_v26, 0.0 }
 0x122   :  { %v683_v56 = vmax.f32 %v533_v47, 0.0  ;;  %v694_v42 = vmax.f32 %v578_v22, 0.0  ;;  %v696_v47 = vmax.f32 %v586_v48, 0.0  ;;  %v703_v4 = vmax.f32 %v613_v8, 0.0 }
 0x123   :  { %v681_v50 = vmax.f32 %v525_v45, 0.0  ;;  %v695_v45 = vmax.f32 %v581_v28, 0.0  ;;  %v626_v25 = vadd.f32 %v1431_v52, %v1342_v38  ;;  %v743_v33 = vrot.slane %v1453_v43, 4 }
 0x124   :  { %v705_v10 = vmax.f32 %v621_v39, 0.0  ;;  %v637_v52 = vadd.f32 %v1342_v38, %v1450_v30 }
 0x125   :  { %v749_v55 = vadd.f32 %v681_v50, %v680_v46  ;;  %v706_v0 = vmax.f32 %v626_v25, 0.0  ;;  %v744_v6 = vadd.f32 %v743_v33, %v1453_v43 }
 0x126   :  { %v709_v21 = vmax.f32 %v637_v52, 0.0 }
 0x127   :  { %v750_v59 = vadd.f32 %v749_v55, %v682_v54  ;;  %v697_v54 = vmax.f32 %v589_v53, 0.0  ;;  %v698_v55 = vmax.f32 %v594_v35, 0.0 }
 0x129   :  { %v751_v2 = vadd.f32 %v750_v59, %v683_v56  ;;  %v699_v59 = vmax.f32 %v597_v49, 0.0 }
 0x12b   :  { %v752_v3 = vadd.f32 %v751_v2, %v684_v60 }
 0x12d   :  { %v753_v12 = vadd.f32 %v752_v3, %v685_v9  ;;  %v701_v3 = vmax.f32 %v605_v13, 0.0 }
 0x12f   :  { %v754_v15 = vadd.f32 %v753_v12, %v686_v11  ;;  %v704_v12 = vmax.f32 %v618_v31, 0.0 }
 0x131   :  { %v755_v18 = vadd.f32 %v754_v15, %v687_v14  ;;  %v629_v15 = vadd.f32 %v1436_v58, %v1342_v38  ;;  %v642_v58 = vadd.f32 %v1443_v17, %v1342_v38 }
 0x133   :  { %v756_v19 = vadd.f32 %v755_v18, %v688_v16 }
 0x135   :  { %v757_v27 = vadd.f32 %v756_v19, %v689_v20  ;;  %v707_v19 = vmax.f32 %v629_v15, 0.0  ;;  %v708_v20 = vmax.f32 %v634_v57, 0.0 }
 0x137   :  { %v758_v34 = vadd.f32 %v757_v27, %v690_v24  ;;  %v745_v24 = vrot.slane %v744_v6, 2 }
 0x139   :  { %v759_v37 = vadd.f32 %v758_v34, %v691_v29  ;;  %v645_v29 = vadd.f32 %v1448_v23, %v1342_v38  ;;  %v710_v34 = vmax.f32 %v642_v58, 0.0  ;;  %v746_v32 = vadd.f32 %v745_v24, %v744_v6 }
 0x13b   :  { %v760_v40 = vadd.f32 %v759_v37, %v692_v36  ;;  %v711_v22 = vmax.f32 %v645_v29, 0.0 }
 0x13d   :  { %v761_v44 = vadd.f32 %v760_v40, %v693_v41  ;;  %v747_v40 = vrot.slane %v746_v32, 1 }
 0x13f   :  { %v762_v46 = vadd.f32 %v761_v44, %v694_v42  ;;  %v748_v30 = vadd.f32 %v747_v40, %v746_v32 }
 0x141   :  { %v763_v50 = vadd.f32 %v762_v46, %v695_v45  ;;  %v786_v17 = vmul.f32 0.00390625, %v748_v30 }
 0x143   :  { %v764_v51 = vadd.f32 %v763_v50, %v696_v47  ;;  %v805_v46 = vpack.c.bf16 %v786_v17, %v786_v17 }
 0x145   :  { %v765_v56 = vadd.f32 %v764_v51, %v697_v54  ;;  %v815_v38 = vunpack.c.l.b16 %v805_v46  ;;  %v982_v51 = vld [vmem:[%s1524_s2 + $0x1] ss:$0 sm:$0xff] }
 0x147   :  { %v766_v60 = vadd.f32 %v765_v56, %v698_v55 }
 0x149   :  { %v767_v63 = vadd.f32 %v766_v60, %v699_v59 }
 0x14b   :  { %v768_v2 = vadd.f32 %v767_v63, %v700_v61 }
 0x14d   :  { %v769_v9 = vadd.f32 %v768_v2, %v701_v3 }
 0x14f   :  { %v770_v11 = vadd.f32 %v769_v9, %v702_v5 }
 0x151   :  { %v771_v14 = vadd.f32 %v770_v11, %v703_v4 }
 0x153   :  { %v772_v16 = vadd.f32 %v771_v14, %v704_v12 }
 0x155   :  { %v773_v18 = vadd.f32 %v772_v16, %v705_v10 }
 0x157   :  { %v774_v62 = vadd.f32 %v773_v18, %v706_v0 }
 0x159   :  { %v775_v26 = vadd.f32 %v774_v62, %v707_v19 }
 0x15b   :  { %v776_v27 = vadd.f32 %v775_v26, %v708_v20 }
 0x15d   :  { %v777_v36 = vadd.f32 %v776_v27, %v709_v21 }
 0x15f   :  { %v778_v43 = vadd.f32 %v777_v36, %v710_v34 }
 0x161   :  { %v779_v37 = vadd.f32 %v778_v43, %v711_v22 }
 0x163   :  { %v780_v28 = vrot.slane %v779_v37, 4 }
 0x165   :  { %v781_v41 = vadd.f32 %v780_v28, %v779_v37 }
 0x167   :  { %v782_v48 = vrot.slane %v781_v41, 2 }
 0x169   :  { %v783_v42 = vadd.f32 %v782_v48, %v781_v41 }
 0x16b   :  { %v784_v44 = vrot.slane %v783_v42, 1 }
 0x16d   :  { %v785_v45 = vadd.f32 %v784_v44, %v783_v42 }
 0x16f   :  { %v787_v47 = vmul.f32 0.00390625, %v785_v45 }
 0x171   :  { %v806_v53 = vpack.c.bf16 %v787_v47, %v787_v47 }
 0x173   :  { %v816_v23 = vunpack.c.l.b16 %v806_v53 }
 0x175   :  { %v818_v35 = vsel %vm817_vm2, %v816_v23, %v815_v38 }
 0x176   :  { %v819_v50 = vpack.c.b16 %v818_v35, %v818_v35 }
 0x178   :  { %1119 = vmatmul.mubr.bf16.vlgmr.msra.gmra.mrb[28].mxu1 %v819_v50 }
 0x24b   :  { %v903_v49 = vpop.f32.mrb[28].mxu1 }
 0x24c   :  { %v904_v54 = vadd.f32 %v982_v51, %v903_v49  ;;  %v1120_v7 = vpop.f32.mrb[29].mxu1 }
 0x24d   :  { %v906_v55 = vpop.f32.mrb[30].mxu1 }
 0x24e   :  { %v909_v56 = vmax.f32 %v904_v54, 0.0  ;;  %v1121_v59 = vpop.f32.mrb[31].mxu1 }
 0x250   :  { %910 = vst [vmem:[%s1525_s3] sm:$0x3] %v909_v56 }

</bundles_post_ra>
